<compile_context>
chip_gen: v7x
topology: tpu7x:2x2x1
jax: 0.10.0
libtpu: 0.0.40
codegen_flags: <defaults>
</compile_context>

<pallas_src>
import functools

import jax
import jax.numpy as jnp
from jax import lax
from jax.experimental import pallas as pl
from jax.experimental.pallas import tpu as pltpu


def _norm_fn_kernel(x_ref, w_ref, b_ref, o_ref, *, eps, fn, true_dim):
    # x_ref: (tile_rows, dim_p); w_ref/b_ref: (1, dim_p), already float32.
    # Padded feature lanes (index >= true_dim) are zero, so plain sums with a
    # 1/true_dim divisor give the exact mean / E[x^2] over the real features.
    x = x_ref[...].astype(jnp.float32)
    inv_n = jnp.float32(1.0 / true_dim)
    # Two independent row reductions (breaks the serial mean->sub->var chain).
    s1 = jnp.sum(x, axis=-1, keepdims=True)
    s2 = jnp.sum(x * x, axis=-1, keepdims=True)
    mean = s1 * inv_n
    var = jnp.maximum(s2 * inv_n - mean * mean, 0.0)    # biased variance (torch)
    inv = lax.rsqrt(var + eps)
    y = (x - mean) * inv
    y = y * w_ref[...] + b_ref[...]
    # Wrapped `fn`, fused in-kernel. It MUST be row-local (elementwise across
    # rows): partial last row-blocks and padded feature lanes contain garbage
    # that is masked on writeback / sliced off in the wrapper.
    o_ref[...] = fn(y).astype(o_ref.dtype)


def _round_up(x, m):
    return ((x + m - 1) // m) * m


def _vmem_budget_bytes(dim_p, itemsize):
    """VMEM budget for the pipelined tiles + temporaries.

    v7x (64 MiB physical): cap // 2 = 32 MiB.
    v5e/v6e (128 MiB):     64 MiB, raised to 96 MiB only for very wide dims so
                           row tiles stay tall; never raised on v7x.
    """
    try:
        cap = int(getattr(pltpu.get_tpu_info(), "vmem_capacity_bytes", 128 << 20))
    except Exception:
        cap = 128 << 20
    budget = min(cap // 2, 64 << 20)
    if cap >= (96 << 20) and dim_p * max(itemsize, 1) >= (64 << 10):
        budget = min((3 * cap) // 4, 96 << 20)
    return budget


def _pick_tile_rows(rows, dim_p, itemsize, vmem_budget):
    """Row tile targeting ~3 MiB input blocks, bounded by true VMEM usage."""
    itemsize = max(itemsize, 1)
    # Per-row VMEM: double-buffered input + output blocks ...
    pipe_bytes = 4 * dim_p * itemsize            # 2 bufs x (in + out)
    # ... plus ~3 f32 tile-sized temporaries inside the body (x cast, x*x / centered, y).
    temp_bytes = 12 * dim_p
    fit = max(vmem_budget // (pipe_bytes + temp_bytes), 8)
    # Bytes-per-block target: ~3 MiB input blocks, never fewer than 1024 rows
    # for narrow dims (amortize the fixed per-grid-step overhead).
    target = max(1024, (3 << 20) // (dim_p * itemsize))
    tile = int(min(fit, target))
    tile = min(tile, _round_up(rows, 8))         # no point exceeding the data
    if tile >= 32:
        tile = (tile // 32) * 32                 # sublane-dense for bf16 / int8
    else:
        tile = _round_up(tile, 8)
    return max(tile, 8)


def norm_module(x, weight, bias, *, fn, eps=1e-5, tile_rows=None):
    """Pallas equivalent of `fn(nn.LayerNorm(dim, eps)(x))`.

    x:      (..., dim)
    weight: (dim,)  LayerNorm gamma
    bias:   (dim,)  LayerNorm beta
    fn:     JAX-traceable, row-local (elementwise) function applied post-norm.
            NOTE: a cross-row `fn` would observe masked/padded garbage rows.
    """
    orig_shape = x.shape
    dim = orig_shape[-1]
    rows = 1
    for s in orig_shape[:-1]:
        rows *= s

    # Lane-dense feature axis: pad dim up to a multiple of 128 with zeros.
    # Zero padding keeps sums exact (divisor uses the true dim); the padded
    # output lanes are sliced off below.
    dim_p = _round_up(dim, 128)

    x2 = x.reshape(rows, dim)
    if dim_p != dim:
        x2 = jnp.pad(x2, ((0, 0), (0, dim_p - dim)))
        w2 = jnp.pad(weight, (0, dim_p - dim))
        b2 = jnp.pad(bias, (0, dim_p - dim))
    else:
        w2 = weight
        b2 = bias
    # Pre-cast params to f32 once in the wrapper (block stays resident).
    w2 = w2.astype(jnp.float32).reshape(1, dim_p)
    b2 = b2.astype(jnp.float32).reshape(1, dim_p)

    itemsize = x.dtype.itemsize
    vmem_budget = _vmem_budget_bytes(dim_p, itemsize)
    if tile_rows is None:
        tile_rows = _pick_tile_rows(rows, dim_p, itemsize, vmem_budget)
        # Keep >= 2 grid steps on medium/large inputs so the "parallel" row
        # axis actually feeds both TensorCores on v7x.
        if rows >= 64 and tile_rows >= rows:
            tile_rows = max(32, min(tile_rows, _round_up(pl.cdiv(rows, 2), 32)))

    # No row padding: the last block may be partial. LayerNorm stats and `fn`
    # are row-local and out-of-bounds writes are masked by Pallas, so garbage
    # tail rows never reach HBM.
    n_tiles = pl.cdiv(rows, tile_rows)

    kernel = functools.partial(_norm_fn_kernel, eps=eps, fn=fn, true_dim=dim)

    out = pl.pallas_call(
        kernel,
        out_shape=jax.ShapeDtypeStruct((rows, dim_p), x.dtype),
        grid_spec=pltpu.PrefetchScalarGridSpec(
            num_scalar_prefetch=0,
            grid=(n_tiles,),
            in_specs=[
                pl.BlockSpec((tile_rows, dim_p), lambda i: (i, 0)),
                pl.BlockSpec((1, dim_p), lambda i: (0, 0)),
                pl.BlockSpec((1, dim_p), lambda i: (0, 0)),
            ],
            out_specs=pl.BlockSpec((tile_rows, dim_p), lambda i: (i, 0)),
        ),
        compiler_params=pltpu.CompilerParams(
            dimension_semantics=("parallel",),   # row tiles shard across TCs
            vmem_limit_bytes=int(vmem_budget),
        ),
    )(x2, w2, b2)

    if dim_p != dim:
        out = out[:, :dim]
    return out.reshape(orig_shape)


def _reference(x, weight, bias, fn, eps=1e-5):
    x32 = x.astype(jnp.float32)
    mean = jnp.mean(x32, axis=-1, keepdims=True)
    var = jnp.mean((x32 - mean) ** 2, axis=-1, keepdims=True)
    y = (x32 - mean) / jnp.sqrt(var + eps)
    y = y * weight.astype(jnp.float32) + bias.astype(jnp.float32)
    return fn(y).astype(x.dtype)


if __name__ == "__main__":
    key = jax.random.PRNGKey(0)

    # The wrapped `fn` — any JAX-traceable row-local function. tanh-approx GELU
    # (guaranteed Mosaic lowering). PyTorch nn.GELU() defaults to exact erf;
    # swap in an erf-based fn if bit-level parity with that module is needed.
    fn = jax.nn.gelu

    # ---- Test 1: lane-dense dim (128), rows fit a single tile ----
    batch, seq, dim = 2, 8, 128
    k1, k2, k3, k4 = jax.random.split(key, 4)
    x = jax.random.normal(k1, (batch, seq, dim), dtype=jnp.float32)
    weight = jnp.ones((dim,), jnp.float32) + 0.1 * jax.random.normal(k2, (dim,))
    bias = 0.1 * jax.random.normal(k3, (dim,))

    out = jax.block_until_ready(norm_module(x, weight, bias, fn=fn))
    ref = _reference(x, weight, bias, fn)
    assert out.shape == x.shape and out.dtype == x.dtype
    assert jnp.allclose(out, ref, atol=3e-5, rtol=3e-5), float(
        jnp.max(jnp.abs(out - ref))
    )

    # ---- Test 2: non-multiple-of-128 dim (lane padding) + partial last row
    # block (rows % tile_rows != 0) ----
    b2_, s2_, d2_ = 3, 7, 96
    ka, kb_, kc = jax.random.split(k4, 3)
    x_b = jax.random.normal(ka, (b2_, s2_, d2_), dtype=jnp.float32)
    w_b = jnp.ones((d2_,), jnp.float32) + 0.1 * jax.random.normal(kb_, (d2_,))
    bb = 0.1 * jax.random.normal(kc, (d2_,))

    out_b = jax.block_until_ready(
        norm_module(x_b, w_b, bb, fn=fn, tile_rows=8)  # 21 rows -> 3 blocks, last partial
    )
    ref_b = _reference(x_b, w_b, bb, fn)
    assert out_b.shape == x_b.shape and out_b.dtype == x_b.dtype
    assert jnp.allclose(out_b, ref_b, atol=3e-5, rtol=3e-5), float(
        jnp.max(jnp.abs(out_b - ref_b))
    )

    print("KERNEL_OK")
</pallas_src>

<mosaic_0001>
module attributes {stable_mosaic.version = 11 : i64} {
  func.func @_norm_fn_kernel(%arg0: i32, %arg1: memref<16x128xf32, #tpu.memory_space<vmem>>, %arg2: memref<1x128xf32, #tpu.memory_space<vmem>>, %arg3: memref<1x128xf32, #tpu.memory_space<vmem>>, %arg4: memref<16x128xf32, #tpu.memory_space<vmem>>) attributes {dimension_semantics = [#tpu.dimension_semantics<parallel>], iteration_bounds = array<i64: 1>, scalar_prefetch = 0 : i64, scratch_operands = 0 : i64, tpu.core_type = #tpu.core_type<tc>, window_params = [{transform_indices = @transform_0, window_bounds = array<i64: 16, 128>}, {pipeline_mode = #tpu.pipeline_mode<synchronous>, transform_indices = @transform_1, window_bounds = array<i64: 1, 128>}, {pipeline_mode = #tpu.pipeline_mode<synchronous>, transform_indices = @transform_2, window_bounds = array<i64: 1, 128>}, {transform_indices = @transform_3, window_bounds = array<i64: 16, 128>}]} {
    %c0 = arith.constant 0 : index
    %c0_0 = arith.constant 0 : index
    %0 = vector.load %arg1[%c0, %c0_0] : memref<16x128xf32, #tpu.memory_space<vmem>>, vector<16x128xf32>
    %cst = arith.constant dense<0.000000e+00> : vector<16xf32>
    %1 = vector.multi_reduction <add>, %0, %cst [1] : vector<16x128xf32> to vector<16xf32>
    %2 = vector.shape_cast %1 : vector<16xf32> to vector<16x1xf32>
    %3 = arith.mulf %0, %0 : vector<16x128xf32>
    %cst_1 = arith.constant dense<0.000000e+00> : vector<16xf32>
    %4 = vector.multi_reduction <add>, %3, %cst_1 [1] : vector<16x128xf32> to vector<16xf32>
    %5 = vector.shape_cast %4 : vector<16xf32> to vector<16x1xf32>
    %cst_2 = arith.constant 7.812500e-03 : f32
    %6 = vector.broadcast %cst_2 : f32 to vector<16x1xf32>
    %7 = arith.mulf %2, %6 : vector<16x1xf32>
    %cst_3 = arith.constant 7.812500e-03 : f32
    %8 = vector.broadcast %cst_3 : f32 to vector<16x1xf32>
    %9 = arith.mulf %5, %8 : vector<16x1xf32>
    %10 = arith.mulf %7, %7 : vector<16x1xf32>
    %11 = arith.subf %9, %10 : vector<16x1xf32>
    %cst_4 = arith.constant 0.000000e+00 : f32
    %12 = vector.broadcast %cst_4 : f32 to vector<16x1xf32>
    %13 = arith.maximumf %11, %12 : vector<16x1xf32>
    %cst_5 = arith.constant 9.99999974E-6 : f32
    %14 = vector.broadcast %cst_5 : f32 to vector<16x1xf32>
    %15 = arith.addf %13, %14 : vector<16x1xf32>
    %16 = math.rsqrt %15 : vector<16x1xf32>
    %17 = vector.broadcast %7 : vector<16x1xf32> to vector<16x128xf32>
    %18 = arith.subf %0, %17 : vector<16x128xf32>
    %19 = vector.broadcast %16 : vector<16x1xf32> to vector<16x128xf32>
    %20 = arith.mulf %18, %19 : vector<16x128xf32>
    %c0_6 = arith.constant 0 : index
    %c0_7 = arith.constant 0 : index
    %21 = vector.load %arg2[%c0_6, %c0_7] : memref<1x128xf32, #tpu.memory_space<vmem>>, vector<1x128xf32>
    %22 = vector.broadcast %21 : vector<1x128xf32> to vector<16x128xf32>
    %23 = arith.mulf %20, %22 : vector<16x128xf32>
    %c0_8 = arith.constant 0 : index
    %c0_9 = arith.constant 0 : index
    %24 = vector.load %arg3[%c0_8, %c0_9] : memref<1x128xf32, #tpu.memory_space<vmem>>, vector<1x128xf32>
    %25 = vector.broadcast %24 : vector<1x128xf32> to vector<16x128xf32>
    %26 = arith.addf %23, %25 : vector<16x128xf32>
    %27 = arith.mulf %26, %26 : vector<16x128xf32>
    %28 = arith.mulf %26, %27 : vector<16x128xf32>
    %cst_10 = arith.constant 4.471500e-02 : f32
    %29 = vector.broadcast %cst_10 : f32 to vector<16x128xf32>
    %30 = arith.mulf %29, %28 : vector<16x128xf32>
    %31 = arith.addf %26, %30 : vector<16x128xf32>
    %cst_11 = arith.constant 0.797884583 : f32
    %32 = vector.broadcast %cst_11 : f32 to vector<16x128xf32>
    %33 = arith.mulf %32, %31 : vector<16x128xf32>
    %34 = math.tanh %33 : vector<16x128xf32>
    %cst_12 = arith.constant 1.000000e+00 : f32
    %35 = vector.broadcast %cst_12 : f32 to vector<16x128xf32>
    %36 = arith.addf %35, %34 : vector<16x128xf32>
    %cst_13 = arith.constant 5.000000e-01 : f32
    %37 = vector.broadcast %cst_13 : f32 to vector<16x128xf32>
    %38 = arith.mulf %37, %36 : vector<16x128xf32>
    %39 = arith.mulf %26, %38 : vector<16x128xf32>
    %c0_14 = arith.constant 0 : index
    %c0_15 = arith.constant 0 : index
    %40 = vector.load %arg4[%c0_14, %c0_15] : memref<16x128xf32, #tpu.memory_space<vmem>>, vector<16x128xf32>
    tpu.vector_store %arg4[%c0_14, %c0_15], %39 {strides = array<i32>} : memref<16x128xf32, #tpu.memory_space<vmem>>, vector<16x128xf32>,
    return
  }
  func.func @transform_0(%arg0: i32) -> (i32, i32) {
    %c0_i32 = arith.constant 0 : i32
    %c0_i32_0 = arith.constant 0 : i32
    return %arg0, %c0_i32 : i32, i32
  }
  func.func @transform_1(%arg0: i32) -> (i32, i32) {
    %c0_i32 = arith.constant 0 : i32
    %c0_i32_0 = arith.constant 0 : i32
    %c0_i32_1 = arith.constant 0 : i32
    return %c0_i32, %c0_i32_0 : i32, i32
  }
  func.func @transform_2(%arg0: i32) -> (i32, i32) {
    %c0_i32 = arith.constant 0 : i32
    %c0_i32_0 = arith.constant 0 : i32
    %c0_i32_1 = arith.constant 0 : i32
    return %c0_i32, %c0_i32_0 : i32, i32
  }
  func.func @transform_3(%arg0: i32) -> (i32, i32) {
    %c0_i32 = arith.constant 0 : i32
    %c0_i32_0 = arith.constant 0 : i32
    return %arg0, %c0_i32 : i32, i32
  }
}

</mosaic_0001>

<bundles_post_ra>
// kernel: tpu_custom_call.1
= control target key start
LH: loop header
LB: loop body
LE: loop exit
PB: predicated region body
PF: predicated region fallthrough
CT: control target
= control target key end

     0   :  { %8 = vsyncpa [#allocation3], 0  ;;  %s335_s0 = inlined_call_operand.hbm [shape: f32[16,128], index: 0, kind: input, shape index: {}]   ;;  %s336_s1 = inlined_call_operand.hbm [shape: f32[1,128], index: 1, kind: input, shape index: {}]   ;;  %s337_s2 = inlined_call_operand.hbm [shape: f32[1,128], index: 2, kind: input, shape index: {}]   ;;  %s338_s3 = inlined_call_operand.hbm [shape: f32[16,128], index: 3, kind: output, shape index: {}]  }
   0x1   :  { %9 = vsyncpa [#allocation6], 0 }
   0x2   :  { %10 = vsyncpa [#allocation4], 0  ;;  %s248_s12 = smov [#allocation5]   ;;  %s249_s14 = smov [#allocation2]  }
   0x3   :  { %s29_s13 = sshll.u32 %s248_s12, 4  ;;  %s16_s15 = sshll.u32 %s249_s14, 4  ;;  %s30_s13 = int_to_ptr.vmem [resolvable:$true] %s29_s13  ;;  %s274_s15 = int_to_ptr.vmem [resolvable:$true] %s16_s15 }
   0x4   :  { %s154_s18 = scalar_lea.hbm %s336_s1, 16 }
   0x5   :  { %p155_p0 = scmp.ne.s32.totalorder %s336_s1, %s154_s18  ;;  %p158_p1 = scmp.lt.u32.totalorder %s154_s18, %s336_s1 }
   0x7   :  { %p160_p2 = pnand %p158_p1, %p155_p0 }
   0x9   :  { %163 = shalt.err (!%p160_p2)
}
   0xa   :  { %s164_s23 = scalar_lea.vmem %s30_s13, 16  ;;  %s168_s24 = scalar_lea.vmem %s30_s13, 32 }
   0xb   :  { %p165_p3 = scmp.ne.s32.totalorder %s30_s13, %s164_s23  ;;  %p169_p4 = scmp.lt.s32.totalorder %s30_s13, %s30_s13 }
   0xc   :  { %p170_p5 = scmp.lt.s32.totalorder %s168_s24, %s164_s23 }
   0xe   :  { %p171_p6 = por %p170_p5, %p169_p4 }
  0x10   :  { %p172_p7 = pnand %p171_p6, %p165_p3 }
  0x12   :  { %175 = shalt.err (!%p172_p7)
}
  0x13   :  { %32 = dma.hbm_to_vmem [thread:$0]  %s336_s1, 16, %s30_s13, [#allocation6]  }
  0x14   :  { %s176_s29 = scalar_lea.hbm %s335_s0, 256 }
  0x15   :  { %p177_p8 = scmp.ne.s32.totalorder %s335_s0, %s176_s29  ;;  %p180_p9 = scmp.lt.u32.totalorder %s176_s29, %s335_s0 }
  0x17   :  { %p182_p10 = pnand %p180_p9, %p177_p8 }
  0x19   :  { %185 = shalt.err (!%p182_p10)
}
  0x1a   :  { %s186_s7 = scalar_lea.vmem %s274_s15, 256  ;;  %p191_p12 = scmp.lt.s32.totalorder %s274_s15, %s274_s15 }
  0x1b   :  { %p187_p11 = scmp.ne.s32.totalorder %s274_s15, %s186_s7  ;;  %p192_p13 = scmp.lt.s32.totalorder %s186_s7, %s186_s7 }
  0x1d   :  { %p193_p0 = por %p192_p13, %p191_p12 }
  0x1f   :  { %p194_p1 = pnand %p193_p0, %p187_p11 }
  0x21   :  { %197 = shalt.err (!%p194_p1)
}
  0x22   :  { %s250_s1 = smov 128   ;;  %s251_s8 = smov 8  }
  0x23   :  { %22 = dma.hbm_to_vmem [thread:$0]  %s335_s0, 256, %s274_s15, [#allocation3], %s250_s1, %s250_s1, %s251_s8  }
  0x24   :  { %s252_s11 = smov [#allocation7]   ;;  %s198_s16 = scalar_lea.hbm %s337_s2, 16 }
  0x25   :  { %s39_s12 = sshll.u32 %s252_s11, 4  ;;  %p199_p2 = scmp.ne.s32.totalorder %s337_s2, %s198_s16  ;;  %s40_s12 = int_to_ptr.vmem [resolvable:$true] %s39_s12 }
  0x26   :  { %p202_p3 = scmp.lt.u32.totalorder %s198_s16, %s337_s2 }
  0x28   :  { %p204_p4 = pnand %p202_p3, %p199_p2 }
  0x2a   :  { %207 = shalt.err (!%p204_p4)
}
  0x2b   :  { %s208_s21 = scalar_lea.vmem %s40_s12, 16  ;;  %s212_s0 = scalar_lea.vmem %s40_s12, 32 }
  0x2c   :  { %p209_p5 = scmp.ne.s32.totalorder %s40_s12, %s208_s21  ;;  %p213_p6 = scmp.lt.s32.totalorder %s40_s12, %s40_s12 }
  0x2d   :  { %p214_p7 = scmp.lt.s32.totalorder %s212_s0, %s208_s21 }
  0x2f   :  { %p215_p8 = por %p214_p7, %p213_p6 }
  0x31   :  { %p216_p9 = pnand %p215_p8, %p209_p5 }
  0x33   :  { %219 = shalt.err (!%p216_p9)
}
  0x34   :  { %42 = dma.hbm_to_vmem [thread:$0]  %s337_s2, 16, %s40_s12, [#allocation6]  }
  0x35   :  { %242 = dma.done.wait [#allocation3], 256  }
  0x36   :  { %243 = vsyncadd [#allocation3], 4294967040 }
  0x37   :  { %244 = dma.done.wait [#allocation6], 32  }
  0x38   :  { %245 = vsyncadd [#allocation6], 4294967264  ;;  %v52_v0 = vld [vmem:[#allocation2] sm:$0xff]  ;;  %v53_v1 = vld [vmem:[#allocation2 + $0x8] sm:$0xff]  ;;  %s253_s2 = smov [#allocation8]  }
  0x39   :  { %54 = vadd.xlane.f32.xlu0 %v52_v0  ;;  %v58_v2 = vmul.f32 %v52_v0, %v52_v0  ;;  %v59_v3 = vmul.f32 %v53_v1, %v53_v1  ;;  %v138_v22 = vld [vmem:[#allocation5] ss:$0 sm:$0xff]  ;;  %v139_v24 = vld [vmem:[#allocation7] ss:$0 sm:$0xff]  ;;  %s125_s23 = sshll.u32 %s253_s2, 4  ;;  %s126_s23 = int_to_ptr.vmem [resolvable:$true] %s125_s23 }
  0x3a   :  { %s220_s24 = scalar_lea.vmem %s126_s23, 256  ;;  %p225_p11 = scmp.lt.s32.totalorder %s126_s23, %s126_s23 }
  0x3b   :  { %60 = vadd.xlane.f32.xlu1 %v58_v2  ;;  %p221_p10 = scmp.ne.s32.totalorder %s126_s23, %s220_s24  ;;  %p226_p12 = scmp.lt.s32.totalorder %s220_s24, %s220_s24 }
  0x3d   :  { %56 = vadd.xlane.f32.xlu0 %v53_v1  ;;  %p227_p13 = por %p226_p12, %p225_p11 }
  0x3f   :  { %62 = vadd.xlane.f32.xlu1 %v59_v3  ;;  %p228_p0 = pnand %p227_p13, %p221_p10 }
  0xc6   :  { %v55_v4 = vpop.xlane.xlu0 %54 }
  0xc7   :  { %v64_v5 = vmul.f32 0.0078125, %v55_v4 }
  0xc8   :  { %v61_v6 = vpop.xlane.xlu1 %60 }
  0xc9   :  { %v68_v7 = vmul.f32 %v64_v5, %v64_v5  ;;  %v66_v8 = vmul.f32 0.0078125, %v61_v6  ;;  %v78_v20 = vsub.f32 %v52_v0, %v64_v5 }
  0xca   :  { %v57_v9 = vpop.xlane.xlu0 %56 }
  0xcb   :  { %v70_v10 = vsub.f32 %v66_v8, %v68_v7  ;;  %v65_v11 = vmul.f32 0.0078125, %v57_v9 }
  0xcc   :  { %v63_v12 = vpop.xlane.xlu1 %62 }
  0xcd   :  { %v72_v13 = vmax.f32 %v70_v10, 0.0  ;;  %v69_v14 = vmul.f32 %v65_v11, %v65_v11  ;;  %v67_v15 = vmul.f32 0.0078125, %v63_v12  ;;  %v79_v25 = vsub.f32 %v53_v1, %v65_v11 }
  0xcf   :  { %v74_v16 = vadd.f32 1e-05, %v72_v13  ;;  %v71_v17 = vsub.f32 %v67_v15, %v69_v14 }
  0xd1   :  { %146 = vrsqrt.f32 %v74_v16  ;;  %v73_v18 = vmax.f32 %v71_v17, 0.0 }
  0xd3   :  { %v75_v19 = vadd.f32 1e-05, %v73_v18 }
  0xd5   :  { %148 = vrsqrt.f32 %v75_v19 }
  0xdb   :  { %v147_v21 = vpop.eup %146 }
  0xdc   :  { %v80_v23 = vmul.f32 %v147_v21, %v78_v20 }
  0xde   :  { %v89_v26 = vmul.f32 %v138_v22, %v80_v23 }
  0xdf   :  { %v149_v27 = vpop.eup %148 }
  0xe0   :  { %v81_v28 = vmul.f32 %v149_v27, %v79_v25  ;;  %v98_v29 = vadd.f32 %v139_v24, %v89_v26 }
  0xe2   :  { %v90_v30 = vmul.f32 %v138_v22, %v81_v28  ;;  %v100_v31 = vmul.f32 %v98_v29, %v98_v29 }
  0xe4   :  { %v99_v32 = vadd.f32 %v139_v24, %v90_v30  ;;  %v102_v33 = vmul.f32 %v100_v31, %v98_v29 }
  0xe6   :  { %v101_v34 = vmul.f32 %v99_v32, %v99_v32  ;;  %v104_v35 = vmul.f32 0.044715, %v102_v33 }
  0xe8   :  { %v103_v36 = vmul.f32 %v101_v34, %v99_v32  ;;  %v106_v37 = vadd.f32 %v104_v35, %v98_v29 }
  0xea   :  { %v105_v38 = vmul.f32 0.044715, %v103_v36  ;;  %v108_v39 = vmul.f32 0.7978846, %v106_v37 }
  0xec   :  { %v107_v40 = vadd.f32 %v105_v38, %v99_v32  ;;  %150 = vtanh.f32 %v108_v39 }
  0xee   :  { %v109_v41 = vmul.f32 0.7978846, %v107_v40 }
  0xf0   :  { %152 = vtanh.f32 %v109_v41 }
  0xf6   :  { %v151_v42 = vpop.eup %150 }
  0xf7   :  { %v112_v43 = vadd.f32 1.0, %v151_v42 }
  0xf9   :  { %v114_v44 = vmul.f32 0.5, %v112_v43 }
  0xfa   :  { %v153_v45 = vpop.eup %152 }
  0xfb   :  { %v113_v46 = vadd.f32 1.0, %v153_v45  ;;  %v116_v47 = vmul.f32 %v114_v44, %v98_v29 }
  0xfd   :  { %v115_v48 = vmul.f32 0.5, %v113_v46  ;;  %118 = vst [vmem:[#allocation8] sm:$0xff] %v116_v47 }
  0xff   :  { %v117_v49 = vmul.f32 %v115_v48, %v99_v32 }
 0x101   :  { %119 = vst [vmem:[#allocation8 + $0x8] sm:$0xff] %v117_v49 }
 0x102   :  { %231 = shalt.err (!%p228_p0)
}
 0x103   :  { %s232_s27 = scalar_lea.hbm %s338_s3, 256 }
 0x104   :  { %p233_p1 = scmp.ne.s32.totalorder %s338_s3, %s232_s27  ;;  %p236_p2 = scmp.lt.u32.totalorder %s232_s27, %s338_s3 }
 0x106   :  { %p238_p3 = pnand %p236_p2, %p233_p1 }
 0x108   :  { %241 = shalt.err (!%p238_p3)
}
 0x109   :  { %131 = dma.vmem_to_hbm [thread:$0]  %s126_s23, 256, %s338_s3, [#allocation4], %s250_s1, %s250_s1, %s251_s8  }
 0x10a   :  { %246 = dma.done.wait [#allocation4], 256  }
 0x10b   :  { %247 = vsyncadd [#allocation4], 4294967040 }
 0x10c   :  { %135 = vsyncpa [#allocation3], 1 }
 0x10d   :  { %136 = vsyncpa [#allocation6], 1 }
 0x10e   :  { %137 = vsyncpa [#allocation4], 1 }

</bundles_post_ra>
